<compile_context>
chip_gen: v6e
topology: v6e:2x2x1
jax: 0.10.0
libtpu: 0.0.40
codegen_flags: <defaults>
</compile_context>

<pallas_src>
import functools

import jax
import jax.numpy as jnp
from jax.experimental import pallas as pl
from jax.experimental.pallas import tpu as pltpu

# ----- small hyper-params consistent with the module's shape relations -----
NUM_UNITS = 32                 # hp-style num_units (GRU hidden size)
NUM_MELS = 16                  # hp.num_mels
OUTPUTS_PER_STEP = 2           # hp.outputs_per_step
OUT_DIM = NUM_MELS * OUTPUTS_PER_STEP
BATCH = 2
MEM_LEN = 8                    # encoder memory length

_VMEM = pl.BlockSpec(memory_space=pltpu.MemorySpace.VMEM)


def _gru_cell(x, h, wih_t, whh_t, bih, bhh, H):
    """PyTorch nn.GRUCell (gate order r, z, n), weights pre-transposed to (in, 3H)."""
    xg = jnp.dot(x, wih_t, preferred_element_type=jnp.float32) + bih
    hg = jnp.dot(h, whh_t, preferred_element_type=jnp.float32) + bhh
    r = jax.nn.sigmoid(xg[:, :H] + hg[:, :H])
    z = jax.nn.sigmoid(xg[:, H:2 * H] + hg[:, H:2 * H])
    n = jnp.tanh(xg[:, 2 * H:] + r * hg[:, 2 * H:])
    return (1.0 - z) * n + z * h


def _attention_decoder_kernel(
        # activations / state
        mem_ref, dec_ref, ah_ref, g1h_ref, g2h_ref,
        # weights (pre-transposed to (in, out); biases as (1, out))
        w1t_ref, w2t_ref, v_ref,
        a_wih_ref, a_whh_ref, a_bih_ref, a_bhh_ref,
        g1_wih_ref, g1_whh_ref, g1_bih_ref, g1_bhh_ref,
        g2_wih_ref, g2_whh_ref, g2_bih_ref, g2_bhh_ref,
        wp_ref, bp_ref, wo_ref, bo_ref,
        # outputs
        out_ref, dt_ref, g1o_ref, g2o_ref,
        *, H):
    B, L, _ = mem_ref.shape
    mem = mem_ref[...]                                            # (B, L, H)

    # keys = W1(memory) for every position: one fused (B*L, H) @ (H, H) matmul.
    keys = jnp.dot(mem.reshape(B * L, H), w1t_ref[...],
                   preferred_element_type=jnp.float32).reshape(B, L, H)

    # d_t = attn_grucell(decoder_input, attn_hidden)
    d_t = _gru_cell(dec_ref[...], ah_ref[...], a_wih_ref[...], a_whh_ref[...],
                    a_bih_ref[...], a_bhh_ref[...], H)
    dt_ref[...] = d_t

    # attention scores: v . tanh(keys + W2 d_t), kept as (B, L, 1)
    d_t_dup = jnp.dot(d_t, w2t_ref[...], preferred_element_type=jnp.float32)
    e = jnp.tanh(keys + d_t_dup[:, None, :])                      # (B, L, H)
    scores = jnp.sum(e * v_ref[...], axis=-1, keepdims=True)      # (B, L, 1)

    # softmax over memory length (torch F.softmax on 2-D -> dim=1)
    scores = scores - jnp.max(scores, axis=1, keepdims=True)
    ew = jnp.exp(scores)
    attn_w = ew / jnp.sum(ew, axis=1, keepdims=True)              # (B, L, 1)

    # context: bmm(attn_w (B,1,L), memory (B,L,H)) -> weighted sum over L
    d_t_prime = jnp.sum(attn_w * mem, axis=1)                     # (B, H)

    # attn_projection(cat([d_t, d_t_prime], dim=1))
    gru1_input = jnp.dot(jnp.concatenate([d_t, d_t_prime], axis=1), wp_ref[...],
                         preferred_element_type=jnp.float32) + bp_ref[...]

    g1 = _gru_cell(gru1_input, g1h_ref[...], g1_wih_ref[...], g1_whh_ref[...],
                   g1_bih_ref[...], g1_bhh_ref[...], H)
    g1o_ref[...] = g1

    gru2_input = gru1_input + g1
    g2 = _gru_cell(gru2_input, g2h_ref[...], g2_wih_ref[...], g2_whh_ref[...],
                   g2_bih_ref[...], g2_bhh_ref[...], H)
    g2o_ref[...] = g2

    bf_out = gru2_input + g2
    out_ref[...] = jnp.dot(bf_out, wo_ref[...],
                           preferred_element_type=jnp.float32) + bo_ref[...]


@jax.jit
def attention_decoder(decoder_input, memory, attn_hidden, gru1_hidden,
                      gru2_hidden, params):
    """One decoder step.  Returns (output, d_t, gru1_hidden, gru2_hidden)."""
    B, L, H = memory.shape
    out, d_t, g1, g2 = pl.pallas_call(
        functools.partial(_attention_decoder_kernel, H=H),
        out_shape=(
            jax.ShapeDtypeStruct((B, OUT_DIM), jnp.float32),
            jax.ShapeDtypeStruct((B, H), jnp.float32),
            jax.ShapeDtypeStruct((B, H), jnp.float32),
            jax.ShapeDtypeStruct((B, H), jnp.float32),
        ),
        in_specs=[_VMEM] * (5 + len(params)),
        out_specs=(_VMEM, _VMEM, _VMEM, _VMEM),
    )(memory, decoder_input, attn_hidden, gru1_hidden, gru2_hidden, *params)
    # output.view(-1, num_mels, outputs_per_step)
    return out.reshape(B, NUM_MELS, OUTPUTS_PER_STEP), d_t, g1, g2


# ---------------------------------------------------------------------------
# Deterministic parameter init (torch layouts), with kernel layouts hoisted:
# every transpose / bias reshape happens once here, never per forward call.
# ---------------------------------------------------------------------------
def init_params(key):
    keys = iter(jax.random.split(key, 32))

    def nrm(shape, scale=0.1):
        return scale * jax.random.normal(next(keys), shape, jnp.float32)

    H = NUM_UNITS
    # torch layouts: Linear weight (out, in); GRUCell weight_ih (3H, in), weight_hh (3H, H)
    w_v = nrm((1, H))                       # v: Linear(H, 1, bias=False)
    w1 = nrm((H, H))                        # W1
    w2 = nrm((H, H))                        # W2
    a_wih, a_whh = nrm((3 * H, H // 2)), nrm((3 * H, H))
    a_bih, a_bhh = nrm((3 * H,)), nrm((3 * H,))
    g1_wih, g1_whh = nrm((3 * H, H)), nrm((3 * H, H))
    g1_bih, g1_bhh = nrm((3 * H,)), nrm((3 * H,))
    g2_wih, g2_whh = nrm((3 * H, H)), nrm((3 * H, H))
    g2_bih, g2_bhh = nrm((3 * H,)), nrm((3 * H,))
    wp, bp = nrm((H, 2 * H)), nrm((H,))     # attn_projection
    wo, bo = nrm((OUT_DIM, H)), nrm((OUT_DIM,))   # out

    return (
        w1.T, w2.T, w_v.reshape(1, 1, H),
        a_wih.T, a_whh.T, a_bih.reshape(1, -1), a_bhh.reshape(1, -1),
        g1_wih.T, g1_whh.T, g1_bih.reshape(1, -1), g1_bhh.reshape(1, -1),
        g2_wih.T, g2_whh.T, g2_bih.reshape(1, -1), g2_bhh.reshape(1, -1),
        wp.T, bp.reshape(1, -1), wo.T, bo.reshape(1, -1),
    )


if __name__ == "__main__":
    key = jax.random.PRNGKey(0)
    pkey, k_dec, k_mem = jax.random.split(key, 3)
    params = init_params(pkey)

    decoder_input = jax.random.normal(k_dec, (BATCH, NUM_UNITS // 2), jnp.float32)
    memory = jax.random.normal(k_mem, (BATCH, MEM_LEN, NUM_UNITS), jnp.float32)
    # inithidden(batch_size): zero hidden states
    attn_hidden = jnp.zeros((BATCH, NUM_UNITS), jnp.float32)
    gru1_hidden = jnp.zeros((BATCH, NUM_UNITS), jnp.float32)
    gru2_hidden = jnp.zeros((BATCH, NUM_UNITS), jnp.float32)

    output, d_t, g1h, g2h = attention_decoder(
        decoder_input, memory, attn_hidden, gru1_hidden, gru2_hidden, params)
    output = jax.block_until_ready(output)

    assert output.shape == (BATCH, NUM_MELS, OUTPUTS_PER_STEP), output.shape
    assert d_t.shape == (BATCH, NUM_UNITS)
    assert g1h.shape == (BATCH, NUM_UNITS)
    assert g2h.shape == (BATCH, NUM_UNITS)
    assert bool(jnp.all(jnp.isfinite(output)))
    assert bool(jnp.all(jnp.isfinite(d_t)))
    assert bool(jnp.all(jnp.isfinite(g1h)))
    assert bool(jnp.all(jnp.isfinite(g2h)))
    print("KERNEL_OK")
</pallas_src>

<mosaic_0001>
module attributes {stable_mosaic.version = 11 : i64} {
  func.func @_attention_decoder_kernel(%arg0: memref<2x8x32xf32, #tpu.memory_space<vmem>>, %arg1: memref<2x16xf32, #tpu.memory_space<vmem>>, %arg2: memref<2x32xf32, #tpu.memory_space<vmem>>, %arg3: memref<2x32xf32, #tpu.memory_space<vmem>>, %arg4: memref<2x32xf32, #tpu.memory_space<vmem>>, %arg5: memref<32x32xf32, #tpu.memory_space<vmem>>, %arg6: memref<32x32xf32, #tpu.memory_space<vmem>>, %arg7: memref<1x1x32xf32, #tpu.memory_space<vmem>>, %arg8: memref<16x96xf32, #tpu.memory_space<vmem>>, %arg9: memref<32x96xf32, #tpu.memory_space<vmem>>, %arg10: memref<1x96xf32, #tpu.memory_space<vmem>>, %arg11: memref<1x96xf32, #tpu.memory_space<vmem>>, %arg12: memref<32x96xf32, #tpu.memory_space<vmem>>, %arg13: memref<32x96xf32, #tpu.memory_space<vmem>>, %arg14: memref<1x96xf32, #tpu.memory_space<vmem>>, %arg15: memref<1x96xf32, #tpu.memory_space<vmem>>, %arg16: memref<32x96xf32, #tpu.memory_space<vmem>>, %arg17: memref<32x96xf32, #tpu.memory_space<vmem>>, %arg18: memref<1x96xf32, #tpu.memory_space<vmem>>, %arg19: memref<1x96xf32, #tpu.memory_space<vmem>>, %arg20: memref<64x32xf32, #tpu.memory_space<vmem>>, %arg21: memref<1x32xf32, #tpu.memory_space<vmem>>, %arg22: memref<32x32xf32, #tpu.memory_space<vmem>>, %arg23: memref<1x32xf32, #tpu.memory_space<vmem>>, %arg24: memref<2x32xf32, #tpu.memory_space<vmem>>, %arg25: memref<2x32xf32, #tpu.memory_space<vmem>>, %arg26: memref<2x32xf32, #tpu.memory_space<vmem>>, %arg27: memref<2x32xf32, #tpu.memory_space<vmem>>) attributes {dimension_semantics = [], scalar_prefetch = 0 : i64, scratch_operands = 0 : i64, tpu.core_type = #tpu.core_type<tc>} {
    %c0 = arith.constant 0 : index
    %c0_0 = arith.constant 0 : index
    %c0_1 = arith.constant 0 : index
    %0 = vector.load %arg0[%c0, %c0_0, %c0_1] : memref<2x8x32xf32, #tpu.memory_space<vmem>>, vector<2x8x32xf32>
    %1 = vector.shape_cast %0 : vector<2x8x32xf32> to vector<16x32xf32>
    %c0_2 = arith.constant 0 : index
    %c0_3 = arith.constant 0 : index
    %2 = vector.load %arg5[%c0_2, %c0_3] : memref<32x32xf32, #tpu.memory_space<vmem>>, vector<32x32xf32>
    %cst = arith.constant dense<0.000000e+00> : vector<16x32xf32>
    %3 = tpu.matmul %1, %2, %cst {dimension_numbers = #tpu.dot_dimension_numbers<[1], [0], [0], [1], [0, 0, 1, 1], [], []>} : vector<16x32xf32>, vector<32x32xf32>, vector<16x32xf32> -> vector<16x32xf32>
    %4 = vector.shape_cast %3 : vector<16x32xf32> to vector<2x8x32xf32>
    %c0_4 = arith.constant 0 : index
    %c0_5 = arith.constant 0 : index
    %5 = vector.load %arg1[%c0_4, %c0_5] : memref<2x16xf32, #tpu.memory_space<vmem>>, vector<2x16xf32>
    %c0_6 = arith.constant 0 : index
    %c0_7 = arith.constant 0 : index
    %6 = vector.load %arg2[%c0_6, %c0_7] : memref<2x32xf32, #tpu.memory_space<vmem>>, vector<2x32xf32>
    %c0_8 = arith.constant 0 : index
    %c0_9 = arith.constant 0 : index
    %7 = vector.load %arg8[%c0_8, %c0_9] : memref<16x96xf32, #tpu.memory_space<vmem>>, vector<16x96xf32>
    %c0_10 = arith.constant 0 : index
    %c0_11 = arith.constant 0 : index
    %8 = vector.load %arg9[%c0_10, %c0_11] : memref<32x96xf32, #tpu.memory_space<vmem>>, vector<32x96xf32>
    %c0_12 = arith.constant 0 : index
    %c0_13 = arith.constant 0 : index
    %9 = vector.load %arg10[%c0_12, %c0_13] : memref<1x96xf32, #tpu.memory_space<vmem>>, vector<1x96xf32>
    %c0_14 = arith.constant 0 : index
    %c0_15 = arith.constant 0 : index
    %10 = vector.load %arg11[%c0_14, %c0_15] : memref<1x96xf32, #tpu.memory_space<vmem>>, vector<1x96xf32>
    %cst_16 = arith.constant dense<0.000000e+00> : vector<2x96xf32>
    %11 = tpu.matmul %5, %7, %cst_16 {dimension_numbers = #tpu.dot_dimension_numbers<[1], [0], [0], [1], [0, 0, 1, 1], [], []>} : vector<2x16xf32>, vector<16x96xf32>, vector<2x96xf32> -> vector<2x96xf32>
    %12 = vector.broadcast %9 : vector<1x96xf32> to vector<2x96xf32>
    %13 = arith.addf %11, %12 : vector<2x96xf32>
    %cst_17 = arith.constant dense<0.000000e+00> : vector<2x96xf32>
    %14 = tpu.matmul %6, %8, %cst_17 {dimension_numbers = #tpu.dot_dimension_numbers<[1], [0], [0], [1], [0, 0, 1, 1], [], []>} : vector<2x32xf32>, vector<32x96xf32>, vector<2x96xf32> -> vector<2x96xf32>
    %15 = vector.broadcast %10 : vector<1x96xf32> to vector<2x96xf32>
    %16 = arith.addf %14, %15 : vector<2x96xf32>
    %17 = vector.extract_strided_slice %13 {offsets = [0, 0], sizes = [2, 32], strides = [1, 1]} : vector<2x96xf32> to vector<2x32xf32>
    %18 = vector.extract_strided_slice %16 {offsets = [0, 0], sizes = [2, 32], strides = [1, 1]} : vector<2x96xf32> to vector<2x32xf32>
    %19 = arith.addf %17, %18 : vector<2x32xf32>
    %20 = arith.negf %19 : vector<2x32xf32>
    %21 = math.exp %20 : vector<2x32xf32>
    %cst_18 = arith.constant 1.000000e+00 : f32
    %22 = vector.broadcast %cst_18 : f32 to vector<2x32xf32>
    %23 = arith.addf %22, %21 : vector<2x32xf32>
    %24 = arith.divf %22, %23 : vector<2x32xf32>
    %25 = vector.extract_strided_slice %13 {offsets = [0, 32], sizes = [2, 32], strides = [1, 1]} : vector<2x96xf32> to vector<2x32xf32>
    %26 = vector.extract_strided_slice %16 {offsets = [0, 32], sizes = [2, 32], strides = [1, 1]} : vector<2x96xf32> to vector<2x32xf32>
    %27 = arith.addf %25, %26 : vector<2x32xf32>
    %28 = arith.negf %27 : vector<2x32xf32>
    %29 = math.exp %28 : vector<2x32xf32>
    %cst_19 = arith.constant 1.000000e+00 : f32
    %30 = vector.broadcast %cst_19 : f32 to vector<2x32xf32>
    %31 = arith.addf %30, %29 : vector<2x32xf32>
    %32 = arith.divf %30, %31 : vector<2x32xf32>
    %33 = vector.extract_strided_slice %13 {offsets = [0, 64], sizes = [2, 32], strides = [1, 1]} : vector<2x96xf32> to vector<2x32xf32>
    %34 = vector.extract_strided_slice %16 {offsets = [0, 64], sizes = [2, 32], strides = [1, 1]} : vector<2x96xf32> to vector<2x32xf32>
    %35 = arith.mulf %24, %34 : vector<2x32xf32>
    %36 = arith.addf %33, %35 : vector<2x32xf32>
    %37 = math.tanh %36 : vector<2x32xf32>
    %cst_20 = arith.constant 1.000000e+00 : f32
    %38 = vector.broadcast %cst_20 : f32 to vector<2x32xf32>
    %39 = arith.subf %38, %32 : vector<2x32xf32>
    %40 = arith.mulf %39, %37 : vector<2x32xf32>
    %41 = arith.mulf %32, %6 : vector<2x32xf32>
    %42 = arith.addf %40, %41 : vector<2x32xf32>
    %c0_21 = arith.constant 0 : index
    %c0_22 = arith.constant 0 : index
    %43 = vector.load %arg25[%c0_21, %c0_22] : memref<2x32xf32, #tpu.memory_space<vmem>>, vector<2x32xf32>
    tpu.vector_store %arg25[%c0_21, %c0_22], %42 {strides = array<i32>} : memref<2x32xf32, #tpu.memory_space<vmem>>, vector<2x32xf32>,
    %c0_23 = arith.constant 0 : index
    %c0_24 = arith.constant 0 : index
    %44 = vector.load %arg6[%c0_23, %c0_24] : memref<32x32xf32, #tpu.memory_space<vmem>>, vector<32x32xf32>
    %cst_25 = arith.constant dense<0.000000e+00> : vector<2x32xf32>
    %45 = tpu.matmul %42, %44, %cst_25 {dimension_numbers = #tpu.dot_dimension_numbers<[1], [0], [0], [1], [0, 0, 1, 1], [], []>} : vector<2x32xf32>, vector<32x32xf32>, vector<2x32xf32> -> vector<2x32xf32>
    %46 = vector.shape_cast %45 : vector<2x32xf32> to vector<2x1x32xf32>
    %47 = vector.broadcast %46 : vector<2x1x32xf32> to vector<2x8x32xf32>
    %48 = arith.addf %4, %47 : vector<2x8x32xf32>
    %49 = math.tanh %48 : vector<2x8x32xf32>
    %c0_26 = arith.constant 0 : index
    %c0_27 = arith.constant 0 : index
    %c0_28 = arith.constant 0 : index
    %50 = vector.load %arg7[%c0_26, %c0_27, %c0_28] : memref<1x1x32xf32, #tpu.memory_space<vmem>>, vector<1x1x32xf32>
    %51 = vector.broadcast %50 : vector<1x1x32xf32> to vector<2x8x32xf32>
    %52 = arith.mulf %49, %51 : vector<2x8x32xf32>
    %cst_29 = arith.constant dense<0.000000e+00> : vector<2x8xf32>
    %53 = vector.multi_reduction <add>, %52, %cst_29 [2] : vector<2x8x32xf32> to vector<2x8xf32>
    %54 = vector.shape_cast %53 : vector<2x8xf32> to vector<2x8x1xf32>
    %cst_30 = arith.constant dense<0xFF800000> : vector<2x1xf32>
    %55 = vector.multi_reduction <maximumf>, %54, %cst_30 [1] : vector<2x8x1xf32> to vector<2x1xf32>
    %56 = vector.shape_cast %55 : vector<2x1xf32> to vector<2x1x1xf32>
    %57 = vector.broadcast %56 : vector<2x1x1xf32> to vector<2x8x1xf32>
    %58 = arith.subf %54, %57 : vector<2x8x1xf32>
    %59 = math.exp %58 : vector<2x8x1xf32>
    %cst_31 = arith.constant dense<0.000000e+00> : vector<2x1xf32>
    %60 = vector.multi_reduction <add>, %59, %cst_31 [1] : vector<2x8x1xf32> to vector<2x1xf32>
    %61 = vector.shape_cast %60 : vector<2x1xf32> to vector<2x1x1xf32>
    %62 = vector.broadcast %61 : vector<2x1x1xf32> to vector<2x8x1xf32>
    %63 = arith.divf %59, %62 : vector<2x8x1xf32>
    %64 = vector.broadcast %63 : vector<2x8x1xf32> to vector<2x8x32xf32>
    %65 = arith.mulf %64, %0 : vector<2x8x32xf32>
    %cst_32 = arith.constant dense<0.000000e+00> : vector<2x32xf32>
    %66 = vector.multi_reduction <add>, %65, %cst_32 [1] : vector<2x8x32xf32> to vector<2x32xf32>
    %67 = tpu.concatenate %42, %66 in 1 : vector<2x32xf32>, vector<2x32xf32> -> vector<2x64xf32>
    %c0_33 = arith.constant 0 : index
    %c0_34 = arith.constant 0 : index
    %68 = vector.load %arg20[%c0_33, %c0_34] : memref<64x32xf32, #tpu.memory_space<vmem>>, vector<64x32xf32>
    %cst_35 = arith.constant dense<0.000000e+00> : vector<2x32xf32>
    %69 = tpu.matmul %67, %68, %cst_35 {dimension_numbers = #tpu.dot_dimension_numbers<[1], [0], [0], [1], [0, 0, 1, 1], [], []>} : vector<2x64xf32>, vector<64x32xf32>, vector<2x32xf32> -> vector<2x32xf32>
    %c0_36 = arith.constant 0 : index
    %c0_37 = arith.constant 0 : index
    %70 = vector.load %arg21[%c0_36, %c0_37] : memref<1x32xf32, #tpu.memory_space<vmem>>, vector<1x32xf32>
    %71 = vector.broadcast %70 : vector<1x32xf32> to vector<2x32xf32>
    %72 = arith.addf %69, %71 : vector<2x32xf32>
    %c0_38 = arith.constant 0 : index
    %c0_39 = arith.constant 0 : index
    %73 = vector.load %arg3[%c0_38, %c0_39] : memref<2x32xf32, #tpu.memory_space<vmem>>, vector<2x32xf32>
    %c0_40 = arith.constant 0 : index
    %c0_41 = arith.constant 0 : index
    %74 = vector.load %arg12[%c0_40, %c0_41] : memref<32x96xf32, #tpu.memory_space<vmem>>, vector<32x96xf32>
    %c0_42 = arith.constant 0 : index
    %c0_43 = arith.constant 0 : index
    %75 = vector.load %arg13[%c0_42, %c0_43] : memref<32x96xf32, #tpu.memory_space<vmem>>, vector<32x96xf32>
    %c0_44 = arith.constant 0 : index
    %c0_45 = arith.constant 0 : index
    %76 = vector.load %arg14[%c0_44, %c0_45] : memref<1x96xf32, #tpu.memory_space<vmem>>, vector<1x96xf32>
    %c0_46 = arith.constant 0 : index
    %c0_47 = arith.constant 0 : index
    %77 = vector.load %arg15[%c0_46, %c0_47] : memref<1x96xf32, #tpu.memory_space<vmem>>, vector<1x96xf32>
    %cst_48 = arith.constant dense<0.000000e+00> : vector<2x96xf32>
    %78 = tpu.matmul %72, %74, %cst_48 {dimension_numbers = #tpu.dot_dimension_numbers<[1], [0], [0], [1], [0, 0, 1, 1], [], []>} : vector<2x32xf32>, vector<32x96xf32>, vector<2x96xf32> -> vector<2x96xf32>
    %79 = vector.broadcast %76 : vector<1x96xf32> to vector<2x96xf32>
    %80 = arith.addf %78, %79 : vector<2x96xf32>
    %cst_49 = arith.constant dense<0.000000e+00> : vector<2x96xf32>
    %81 = tpu.matmul %73, %75, %cst_49 {dimension_numbers = #tpu.dot_dimension_numbers<[1], [0], [0], [1], [0, 0, 1, 1], [], []>} : vector<2x32xf32>, vector<32x96xf32>, vector<2x96xf32> -> vector<2x96xf32>
    %82 = vector.broadcast %77 : vector<1x96xf32> to vector<2x96xf32>
    %83 = arith.addf %81, %82 : vector<2x96xf32>
    %84 = vector.extract_strided_slice %80 {offsets = [0, 0], sizes = [2, 32], strides = [1, 1]} : vector<2x96xf32> to vector<2x32xf32>
    %85 = vector.extract_strided_slice %83 {offsets = [0, 0], sizes = [2, 32], strides = [1, 1]} : vector<2x96xf32> to vector<2x32xf32>
    %86 = arith.addf %84, %85 : vector<2x32xf32>
    %87 = arith.negf %86 : vector<2x32xf32>
    %88 = math.exp %87 : vector<2x32xf32>
    %cst_50 = arith.constant 1.000000e+00 : f32
    %89 = vector.broadcast %cst_50 : f32 to vector<2x32xf32>
    %90 = arith.addf %89, %88 : vector<2x32xf32>
    %91 = arith.divf %89, %90 : vector<2x32xf32>
    %92 = vector.extract_strided_slice %80 {offsets = [0, 32], sizes = [2, 32], strides = [1, 1]} : vector<2x96xf32> to vector<2x32xf32>
    %93 = vector.extract_strided_slice %83 {offsets = [0, 32], sizes = [2, 32], strides = [1, 1]} : vector<2x96xf32> to vector<2x32xf32>
    %94 = arith.addf %92, %93 : vector<2x32xf32>
    %95 = arith.negf %94 : vector<2x32xf32>
    %96 = math.exp %95 : vector<2x32xf32>
    %cst_51 = arith.constant 1.000000e+00 : f32
    %97 = vector.broadcast %cst_51 : f32 to vector<2x32xf32>
    %98 = arith.addf %97, %96 : vector<2x32xf32>
    %99 = arith.divf %97, %98 : vector<2x32xf32>
    %100 = vector.extract_strided_slice %80 {offsets = [0, 64], sizes = [2, 32], strides = [1, 1]} : vector<2x96xf32> to vector<2x32xf32>
    %101 = vector.extract_strided_slice %83 {offsets = [0, 64], sizes = [2, 32], strides = [1, 1]} : vector<2x96xf32> to vector<2x32xf32>
    %102 = arith.mulf %91, %101 : vector<2x32xf32>
    %103 = arith.addf %100, %102 : vector<2x32xf32>
    %104 = math.tanh %103 : vector<2x32xf32>
    %cst_52 = arith.constant 1.000000e+00 : f32
    %105 = vector.broadcast %cst_52 : f32 to vector<2x32xf32>
    %106 = arith.subf %105, %99 : vector<2x32xf32>
    %107 = arith.mulf %106, %104 : vector<2x32xf32>
    %108 = arith.mulf %99, %73 : vector<2x32xf32>
    %109 = arith.addf %107, %108 : vector<2x32xf32>
    %c0_53 = arith.constant 0 : index
    %c0_54 = arith.constant 0 : index
    %110 = vector.load %arg26[%c0_53, %c0_54] : memref<2x32xf32, #tpu.memory_space<vmem>>, vector<2x32xf32>
    tpu.vector_store %arg26[%c0_53, %c0_54], %109 {strides = array<i32>} : memref<2x32xf32, #tpu.memory_space<vmem>>, vector<2x32xf32>,
    %111 = arith.addf %72, %109 : vector<2x32xf32>
    %c0_55 = arith.constant 0 : index
    %c0_56 = arith.constant 0 : index
    %112 = vector.load %arg4[%c0_55, %c0_56] : memref<2x32xf32, #tpu.memory_space<vmem>>, vector<2x32xf32>
    %c0_57 = arith.constant 0 : index
    %c0_58 = arith.constant 0 : index
    %113 = vector.load %arg16[%c0_57, %c0_58] : memref<32x96xf32, #tpu.memory_space<vmem>>, vector<32x96xf32>
    %c0_59 = arith.constant 0 : index
    %c0_60 = arith.constant 0 : index
    %114 = vector.load %arg17[%c0_59, %c0_60] : memref<32x96xf32, #tpu.memory_space<vmem>>, vector<32x96xf32>
    %c0_61 = arith.constant 0 : index
    %c0_62 = arith.constant 0 : index
    %115 = vector.load %arg18[%c0_61, %c0_62] : memref<1x96xf32, #tpu.memory_space<vmem>>, vector<1x96xf32>
    %c0_63 = arith.constant 0 : index
    %c0_64 = arith.constant 0 : index
    %116 = vector.load %arg19[%c0_63, %c0_64] : memref<1x96xf32, #tpu.memory_space<vmem>>, vector<1x96xf32>
    %cst_65 = arith.constant dense<0.000000e+00> : vector<2x96xf32>
    %117 = tpu.matmul %111, %113, %cst_65 {dimension_numbers = #tpu.dot_dimension_numbers<[1], [0], [0], [1], [0, 0, 1, 1], [], []>} : vector<2x32xf32>, vector<32x96xf32>, vector<2x96xf32> -> vector<2x96xf32>
    %118 = vector.broadcast %115 : vector<1x96xf32> to vector<2x96xf32>
    %119 = arith.addf %117, %118 : vector<2x96xf32>
    %cst_66 = arith.constant dense<0.000000e+00> : vector<2x96xf32>
    %120 = tpu.matmul %112, %114, %cst_66 {dimension_numbers = #tpu.dot_dimension_numbers<[1], [0], [0], [1], [0, 0, 1, 1], [], []>} : vector<2x32xf32>, vector<32x96xf32>, vector<2x96xf32> -> vector<2x96xf32>
    %121 = vector.broadcast %116 : vector<1x96xf32> to vector<2x96xf32>
    %122 = arith.addf %120, %121 : vector<2x96xf32>
    %123 = vector.extract_strided_slice %119 {offsets = [0, 0], sizes = [2, 32], strides = [1, 1]} : vector<2x96xf32> to vector<2x32xf32>
    %124 = vector.extract_strided_slice %122 {offsets = [0, 0], sizes = [2, 32], strides = [1, 1]} : vector<2x96xf32> to vector<2x32xf32>
    %125 = arith.addf %123, %124 : vector<2x32xf32>
    %126 = arith.negf %125 : vector<2x32xf32>
    %127 = math.exp %126 : vector<2x32xf32>
    %cst_67 = arith.constant 1.000000e+00 : f32
    %128 = vector.broadcast %cst_67 : f32 to vector<2x32xf32>
    %129 = arith.addf %128, %127 : vector<2x32xf32>
    %130 = arith.divf %128, %129 : vector<2x32xf32>
    %131 = vector.extract_strided_slice %119 {offsets = [0, 32], sizes = [2, 32], strides = [1, 1]} : vector<2x96xf32> to vector<2x32xf32>
    %132 = vector.extract_strided_slice %122 {offsets = [0, 32], sizes = [2, 32], strides = [1, 1]} : vector<2x96xf32> to vector<2x32xf32>
    %133 = arith.addf %131, %132 : vector<2x32xf32>
    %134 = arith.negf %133 : vector<2x32xf32>
    %135 = math.exp %134 : vector<2x32xf32>
    %cst_68 = arith.constant 1.000000e+00 : f32
    %136 = vector.broadcast %cst_68 : f32 to vector<2x32xf32>
    %137 = arith.addf %136, %135 : vector<2x32xf32>
    %138 = arith.divf %136, %137 : vector<2x32xf32>
    %139 = vector.extract_strided_slice %119 {offsets = [0, 64], sizes = [2, 32], strides = [1, 1]} : vector<2x96xf32> to vector<2x32xf32>
    %140 = vector.extract_strided_slice %122 {offsets = [0, 64], sizes = [2, 32], strides = [1, 1]} : vector<2x96xf32> to vector<2x32xf32>
    %141 = arith.mulf %130, %140 : vector<2x32xf32>
    %142 = arith.addf %139, %141 : vector<2x32xf32>
    %143 = math.tanh %142 : vector<2x32xf32>
    %cst_69 = arith.constant 1.000000e+00 : f32
    %144 = vector.broadcast %cst_69 : f32 to vector<2x32xf32>
    %145 = arith.subf %144, %138 : vector<2x32xf32>
    %146 = arith.mulf %145, %143 : vector<2x32xf32>
    %147 = arith.mulf %138, %112 : vector<2x32xf32>
    %148 = arith.addf %146, %147 : vector<2x32xf32>
    %c0_70 = arith.constant 0 : index
    %c0_71 = arith.constant 0 : index
    %149 = vector.load %arg27[%c0_70, %c0_71] : memref<2x32xf32, #tpu.memory_space<vmem>>, vector<2x32xf32>
    tpu.vector_store %arg27[%c0_70, %c0_71], %148 {strides = array<i32>} : memref<2x32xf32, #tpu.memory_space<vmem>>, vector<2x32xf32>,
    %150 = arith.addf %111, %148 : vector<2x32xf32>
    %c0_72 = arith.constant 0 : index
    %c0_73 = arith.constant 0 : index
    %151 = vector.load %arg22[%c0_72, %c0_73] : memref<32x32xf32, #tpu.memory_space<vmem>>, vector<32x32xf32>
    %cst_74 = arith.constant dense<0.000000e+00> : vector<2x32xf32>
    %152 = tpu.matmul %150, %151, %cst_74 {dimension_numbers = #tpu.dot_dimension_numbers<[1], [0], [0], [1], [0, 0, 1, 1], [], []>} : vector<2x32xf32>, vector<32x32xf32>, vector<2x32xf32> -> vector<2x32xf32>
    %c0_75 = arith.constant 0 : index
    %c0_76 = arith.constant 0 : index
    %153 = vector.load %arg23[%c0_75, %c0_76] : memref<1x32xf32, #tpu.memory_space<vmem>>, vector<1x32xf32>
    %154 = vector.broadcast %153 : vector<1x32xf32> to vector<2x32xf32>
    %155 = arith.addf %152, %154 : vector<2x32xf32>
    %c0_77 = arith.constant 0 : index
    %c0_78 = arith.constant 0 : index
    %156 = vector.load %arg24[%c0_77, %c0_78] : memref<2x32xf32, #tpu.memory_space<vmem>>, vector<2x32xf32>
    tpu.vector_store %arg24[%c0_77, %c0_78], %155 {strides = array<i32>} : memref<2x32xf32, #tpu.memory_space<vmem>>, vector<2x32xf32>,
    return
  }
}

</mosaic_0001>

<bundles_post_ra>
// kernel: attention_decoder.1
= control target key start
LH: loop header
LB: loop body
LE: loop exit
PB: predicated region body
PF: predicated region fallthrough
CT: control target
= control target key end

     0   :  { %s2476_s0 = inlined_call_operand.hbm [shape: f32[2,8,32], index: 0, kind: input, shape index: {}]   ;;  %s2477_s1 = inlined_call_operand.hbm [shape: f32[2,16], index: 1, kind: input, shape index: {}]   ;;  %s2478_s2 = inlined_call_operand.hbm [shape: f32[2,32], index: 2, kind: input, shape index: {}]   ;;  %s2479_s3 = inlined_call_operand.hbm [shape: f32[2,32], index: 3, kind: input, shape index: {}]   ;;  %s2480_s4 = inlined_call_operand.hbm [shape: f32[2,32], index: 4, kind: input, shape index: {}]   ;;  %s2481_s5 = inlined_call_operand.vmem [shape: f32[32,32], index: 5, kind: input, shape index: {}]   ;;  %s2482_s6 = inlined_call_operand.vmem [shape: f32[32,32], index: 6, kind: input, shape index: {}]   ;;  %s2483_s7 = inlined_call_operand.hbm [shape: f32[1,1,32], index: 7, kind: input, shape index: {}]   ;;  %s2484_s8 = inlined_call_operand.hbm [shape: f32[16,96], index: 8, kind: input, shape index: {}]   ;;  %s2485_s9 = inlined_call_operand.vmem [shape: f32[32,96], index: 9, kind: input, shape index: {}]   ;;  %s2486_s10 = inlined_call_operand.hbm [shape: f32[1,96], index: 10, kind: input, shape index: {}]   ;;  %s2487_s11 = inlined_call_operand.hbm [shape: f32[1,96], index: 11, kind: input, shape index: {}]   ;;  %s2488_s12 = inlined_call_operand.hbm [shape: f32[32,96], index: 12, kind: input, shape index: {}]   ;;  %s2489_s13 = inlined_call_operand.hbm [shape: f32[32,96], index: 13, kind: input, shape index: {}]   ;;  %s2490_s14 = inlined_call_operand.hbm [shape: f32[1,96], index: 14, kind: input, shape index: {}]   ;;  %s2491_s15 = inlined_call_operand.hbm [shape: f32[1,96], index: 15, kind: input, shape index: {}]   ;;  %s2492_s16 = inlined_call_operand.hbm [shape: f32[32,96], index: 16, kind: input, shape index: {}]   ;;  %s2493_s17 = inlined_call_operand.hbm [shape: f32[32,96], index: 17, kind: input, shape index: {}]   ;;  %s2494_s18 = inlined_call_operand.hbm [shape: f32[1,96], index: 18, kind: input, shape index: {}]   ;;  %s2495_s19 = inlined_call_operand.vmem [shape: f32[1,96], index: 19, kind: input, shape index: {}]   ;;  %s2496_s20 = inlined_call_operand.vmem [shape: f32[64,32], index: 20, kind: input, shape index: {}]   ;;  %s2497_s21 = inlined_call_operand.vmem [shape: f32[1,32], index: 21, kind: input, shape index: {}]   ;;  %s2498_s22 = inlined_call_operand.vmem [shape: f32[32,32], index: 22, kind: input, shape index: {}]   ;;  %s2499_s23 = inlined_call_operand.vmem [shape: f32[1,32], index: 23, kind: input, shape index: {}]   ;;  %s2500_s24 = inlined_call_operand.vmem [shape: f32[2,32], index: 24, kind: output, shape index: {0}]   ;;  %s2501_s25 = inlined_call_operand.hbm [shape: f32[2,32], index: 25, kind: output, shape index: {1}]   ;;  %s2502_s26 = inlined_call_operand.hbm [shape: f32[2,32], index: 26, kind: output, shape index: {2}]   ;;  %s2503_s27 = inlined_call_operand.hbm [shape: f32[2,32], index: 27, kind: output, shape index: {3}]  }
   0x1   :  { %2507 = sst [smem:[#allocation43_spill]] %s2476_s0 }
   0x2   :  { %2508 = sst [smem:[#allocation44_spill]] %s2477_s1 }
   0x3   :  { %2509 = sst [smem:[#allocation45_spill]] %s2478_s2 }
   0x4   :  { %2510 = sst [smem:[#allocation46_spill]] %s2479_s3 }
   0x5   :  { %2511 = sst [smem:[#allocation47_spill]] %s2480_s4 }
   0x6   :  { %2512 = sst [smem:[#allocation48_spill]] %s2481_s5 }
   0x7   :  { %2513 = sst [smem:[#allocation49_spill]] %s2482_s6 }
   0x8   :  { %2514 = sst [smem:[#allocation50_spill]] %s2483_s7 }
   0x9   :  { %2515 = sst [smem:[#allocation51_spill]] %s2484_s8 }
   0xa   :  { %2516 = sst [smem:[#allocation52_spill]] %s2485_s9 }
   0xb   :  { %2517 = sst [smem:[#allocation53_spill]] %s2486_s10 }
   0xc   :  { %2518 = sst [smem:[#allocation54_spill]] %s2487_s11 }
   0xd   :  { %33 = vsyncpa [#allocation3], 0 }
   0xe   :  { %34 = vsyncpa [#allocation6], 0 }
   0xf   :  { %35 = vsyncpa [#allocation9], 0 }
  0x10   :  { %36 = vsyncpa [#allocation12], 0 }
  0x11   :  { %37 = vsyncpa [#allocation15], 0 }
  0x12   :  { %38 = vsyncpa [#allocation18], 0 }
  0x13   :  { %39 = vsyncpa [#allocation21], 0 }
  0x14   :  { %40 = vsyncpa [#allocation24], 0 }
  0x15   :  { %41 = vsyncpa [#allocation27], 0 }
  0x16   :  { %42 = vsyncpa [#allocation4], 0 }
  0x17   :  { %43 = vsyncpa [#allocation30], 0  ;;  %s2043_s7 = smov [#allocation5]   ;;  %s2044_s8 = smov [#allocation8]  }
  0x18   :  { %s62_s4 = sshll.u32 %s2043_s7, 4  ;;  %s82_s30 = sshll.u32 %s2044_s8, 4  ;;  %s63_s4 = int_to_ptr.vmem [resolvable:$true] %s62_s4  ;;  %s83_s30 = int_to_ptr.vmem [resolvable:$true] %s82_s30 }
  0x19   :  { %s1649_s9 = scalar_lea.vmem %s63_s4, 32  ;;  %p1654_p1 = scmp.lt.s32.totalorder %s63_s4, %s63_s4 }
  0x1a   :  { %p1650_p0 = scmp.ne.s32.totalorder %s63_s4, %s1649_s9  ;;  %p1655_p2 = scmp.lt.s32.totalorder %s1649_s9, %s1649_s9 }
  0x1c   :  { %p1656_p3 = por %p1655_p2, %p1654_p1 }
  0x1e   :  { %p1657_p4 = pnand %p1656_p3, %p1650_p0 }
  0x20   :  { %1660 = shalt.err (!%p1657_p4)
}
  0x21   :  { %s2519_s0 = sld [smem:[#allocation44_spill]]  ;;  %s1669_s10 = scalar_lea.vmem %s83_s30, 32 }
  0x22   :  { %p1670_p5 = scmp.ne.s32.totalorder %s83_s30, %s1669_s10  ;;  %p1674_p6 = scmp.lt.s32.totalorder %s83_s30, %s83_s30 }
  0x23   :  { %p1675_p7 = scmp.lt.s32.totalorder %s1669_s10, %s1669_s10 }
  0x25   :  { %p1676_p8 = por %p1675_p7, %p1674_p6 }
  0x27   :  { %65 = dma.hbm_to_vmem [thread:$0]  %s2519_s0, 32, %s63_s4, [#allocation6]  }
  0x28   :  { %p1677_p9 = pnand %p1676_p8, %p1670_p5 }
  0x2a   :  { %1680 = shalt.err (!%p1677_p9)
}
  0x2b   :  { %s2520_s6 = sld [smem:[#allocation46_spill]]  ;;  %s2045_s11 = smov [#allocation11]  }
  0x2c   :  { %s106_s2 = sshll.u32 %s2045_s11, 4  ;;  %s2046_s3 = smov [#allocation14]   ;;  %s107_s2 = int_to_ptr.vmem [resolvable:$true] %s106_s2 }
  0x2d   :  { %s130_s7 = sshll.u32 %s2046_s3, 4  ;;  %s1689_s8 = scalar_lea.vmem %s107_s2, 16  ;;  %s131_s7 = int_to_ptr.vmem [resolvable:$true] %s130_s7 }
  0x2e   :  { %p1690_p10 = scmp.ne.s32.totalorder %s107_s2, %s1689_s8  ;;  %s1693_s4 = scalar_lea.vmem %s107_s2, 32 }
  0x2f   :  { %p1694_p11 = scmp.lt.s32.totalorder %s107_s2, %s107_s2  ;;  %p1695_p12 = scmp.lt.s32.totalorder %s1693_s4, %s1689_s8 }
  0x31   :  { %85 = dma.hbm_to_vmem [thread:$0]  %s2520_s6, 32, %s83_s30, [#allocation9]  }
  0x32   :  { %p1696_p13 = por %p1695_p12, %p1694_p11 }
  0x34   :  { %p1697_p0 = pnand %p1696_p13, %p1690_p10 }
  0x36   :  { %1700 = shalt.err (!%p1697_p0)
}
  0x37   :  { %s2521_s28 = sld [smem:[#allocation50_spill]]  ;;  %s1709_s0 = scalar_lea.vmem %s131_s7, 16 }
  0x38   :  { %p1710_p1 = scmp.ne.s32.totalorder %s131_s7, %s1709_s0  ;;  %s1713_s30 = scalar_lea.vmem %s131_s7, 32 }
  0x39   :  { %p1714_p2 = scmp.lt.s32.totalorder %s131_s7, %s131_s7  ;;  %p1715_p3 = scmp.lt.s32.totalorder %s1713_s30, %s1709_s0 }
  0x3b   :  { %p1716_p4 = por %p1715_p3, %p1714_p2 }
  0x3d   :  { %109 = dma.hbm_to_vmem [thread:$0]  %s2521_s28, 16, %s107_s2, [#allocation12]  }
  0x3e   :  { %p1717_p5 = pnand %p1716_p4, %p1710_p1 }
  0x40   :  { %1720 = shalt.err (!%p1717_p5)
}
  0x41   :  { %s2522_s1 = sld [smem:[#allocation53_spill]]  ;;  %s2047_s6 = smov [#allocation17]  }
  0x42   :  { %s149_s11 = sshll.u32 %s2047_s6, 4  ;;  %s2048_s3 = smov [#allocation20]   ;;  %s150_s11 = int_to_ptr.vmem [resolvable:$true] %s149_s11 }
  0x43   :  { %s174_s8 = sshll.u32 %s2048_s3, 4  ;;  %s1729_s4 = scalar_lea.vmem %s150_s11, 512  ;;  %s175_s8 = int_to_ptr.vmem [resolvable:$true] %s174_s8 }
  0x44   :  { %p1730_p6 = scmp.ne.s32.totalorder %s150_s11, %s1729_s4  ;;  %p1734_p7 = scmp.lt.s32.totalorder %s150_s11, %s150_s11 }
  0x45   :  { %p1735_p8 = scmp.lt.s32.totalorder %s1729_s4, %s1729_s4 }
  0x47   :  { %133 = dma.hbm_to_vmem [thread:$0]  %s2522_s1, 16, %s131_s7, [#allocation15]  }
  0x48   :  { %p1736_p9 = por %p1735_p8, %p1734_p7 }
  0x4a   :  { %p1737_p10 = pnand %p1736_p9, %p1730_p6 }
  0x4c   :  { %1740 = shalt.err (!%p1737_p10)
}
  0x4d   :  { %s2049_s2 = smov 128   ;;  %s2050_s9 = smov 8  }
  0x4e   :  { %155 = dma.hbm_to_vmem [thread:$0]  %s2488_s12, 512, %s150_s11, [#allocation18], %s2049_s2, %s2049_s2, %s2050_s9  }
  0x4f   :  { %s1749_s28 = scalar_lea.vmem %s175_s8, 16  ;;  %s1753_s0 = scalar_lea.vmem %s175_s8, 32 }
  0x50   :  { %p1750_p11 = scmp.ne.s32.totalorder %s175_s8, %s1749_s28  ;;  %p1754_p12 = scmp.lt.s32.totalorder %s175_s8, %s175_s8 }
  0x51   :  { %p1755_p13 = scmp.lt.s32.totalorder %s1753_s0, %s1749_s28 }
  0x53   :  { %p1756_p0 = por %p1755_p13, %p1754_p12 }
  0x55   :  { %p1757_p1 = pnand %p1756_p0, %p1750_p11 }
  0x57   :  { %1760 = shalt.err (!%p1757_p1)
}
  0x58   :  { %177 = dma.hbm_to_vmem [thread:$0]  %s2490_s14, 16, %s175_s8, [#allocation21]  }
  0x59   :  { %s2051_s29 = smov [#allocation23]   ;;  %s2052_s6 = smov [#allocation2]  }
  0x5a   :  { %s193_s1 = sshll.u32 %s2051_s29, 4  ;;  %s49_s3 = sshll.u32 %s2052_s6, 4  ;;  %s194_s1 = int_to_ptr.vmem [resolvable:$true] %s193_s1  ;;  %s50_s3 = int_to_ptr.vmem [resolvable:$true] %s49_s3 }
  0x5b   :  { %s1769_s4 = scalar_lea.vmem %s194_s1, 512  ;;  %p1774_p3 = scmp.lt.s32.totalorder %s194_s1, %s194_s1 }
  0x5c   :  { %p1770_p2 = scmp.ne.s32.totalorder %s194_s1, %s1769_s4  ;;  %p1775_p4 = scmp.lt.s32.totalorder %s1769_s4, %s1769_s4 }
  0x5e   :  { %p1776_p5 = por %p1775_p4, %p1774_p3 }
  0x60   :  { %p1777_p6 = pnand %p1776_p5, %p1770_p2 }
  0x62   :  { %1780 = shalt.err (!%p1777_p6)
}
  0x63   :  { %199 = dma.hbm_to_vmem [thread:$0]  %s2492_s16, 512, %s194_s1, [#allocation24], %s2049_s2, %s2049_s2, %s2050_s9  }
  0x64   :  { %s1789_s14 = scalar_lea.vmem %s50_s3, 256  ;;  %p1794_p8 = scmp.lt.s32.totalorder %s50_s3, %s50_s3 }
  0x65   :  { %p1790_p7 = scmp.ne.s32.totalorder %s50_s3, %s1789_s14  ;;  %p1795_p9 = scmp.lt.s32.totalorder %s1789_s14, %s1789_s14 }
  0x67   :  { %p1796_p10 = por %p1795_p9, %p1794_p8 }
  0x69   :  { %p1797_p11 = pnand %p1796_p10, %p1790_p7 }
  0x6b   :  { %1800 = shalt.err (!%p1797_p11)
}
  0x6c   :  { %s2523_s7 = sld [smem:[#allocation43_spill]]  ;;  %s2053_s28 = smov [#allocation7]  }
  0x6d   :  { %s72_s0 = sshll.u32 %s2053_s28, 4  ;;  %s2054_s30 = smov [#allocation10]   ;;  %s73_s0 = int_to_ptr.vmem [resolvable:$true] %s72_s0 }
  0x6e   :  { %s92_s10 = sshll.u32 %s2054_s30, 4  ;;  %s1809_s16 = scalar_lea.vmem %s73_s0, 32  ;;  %s93_s10 = int_to_ptr.vmem [resolvable:$true] %s92_s10 }
  0x6f   :  { %p1810_p12 = scmp.ne.s32.totalorder %s73_s0, %s1809_s16  ;;  %p1814_p13 = scmp.lt.s32.totalorder %s73_s0, %s73_s0 }
  0x70   :  { %p1815_p0 = scmp.lt.s32.totalorder %s1809_s16, %s1809_s16 }
  0x72   :  { %55 = dma.hbm_to_vmem [thread:$0]  %s2523_s7, 256, %s50_s3, [#allocation3], %s2049_s2, %s2049_s2, %s2050_s9  }
  0x73   :  { %p1816_p1 = por %p1815_p0, %p1814_p13 }
  0x75   :  { %p1817_p2 = pnand %p1816_p1, %p1810_p12 }
  0x77   :  { %1820 = shalt.err (!%p1817_p2)
}
  0x78   :  { %s2524_s6 = sld [smem:[#allocation45_spill]]  ;;  %s1829_s4 = scalar_lea.vmem %s93_s10, 32 }
  0x79   :  { %p1830_p3 = scmp.ne.s32.totalorder %s93_s10, %s1829_s4  ;;  %p1834_p4 = scmp.lt.s32.totalorder %s93_s10, %s93_s10 }
  0x7a   :  { %p1835_p5 = scmp.lt.s32.totalorder %s1829_s4, %s1829_s4 }
  0x7c   :  { %p1836_p6 = por %p1835_p5, %p1834_p4 }
  0x7e   :  { %75 = dma.hbm_to_vmem [thread:$0]  %s2524_s6, 32, %s73_s0, [#allocation6]  }
  0x7f   :  { %p1837_p7 = pnand %p1836_p6, %p1830_p3 }
  0x81   :  { %1840 = shalt.err (!%p1837_p7)
}
  0x82   :  { %s2525_s11 = sld [smem:[#allocation47_spill]]  ;;  %s2055_s14 = smov [#allocation13]  }
  0x83   :  { %s115_s8 = sshll.u32 %s2055_s14, 4  ;;  %s2056_s5 = smov [#allocation16]   ;;  %s116_s8 = int_to_ptr.vmem [resolvable:$true] %s115_s8 }
  0x84   :  { %s140_s7 = sshll.u32 %s2056_s5, 4  ;;  %s1849_s28 = scalar_lea.vmem %s116_s8, 256  ;;  %s141_s7 = int_to_ptr.vmem [resolvable:$true] %s140_s7 }
  0x85   :  { %p1850_p8 = scmp.ne.s32.totalorder %s116_s8, %s1849_s28  ;;  %p1854_p9 = scmp.lt.s32.totalorder %s116_s8, %s116_s8 }
  0x86   :  { %p1855_p10 = scmp.lt.s32.totalorder %s1849_s28, %s1849_s28 }
  0x88   :  { %95 = dma.hbm_to_vmem [thread:$0]  %s2525_s11, 32, %s93_s10, [#allocation9]  }
  0x89   :  { %p1856_p11 = por %p1855_p10, %p1854_p9 }
  0x8b   :  { %p1857_p12 = pnand %p1856_p11, %p1850_p8 }
  0x8d   :  { %1860 = shalt.err (!%p1857_p12)
}
  0x8e   :  { %s2526_s16 = sld [smem:[#allocation51_spill]]  ;;  %s1869_s10 = scalar_lea.vmem %s141_s7, 16 }
  0x8f   :  { %p1870_p13 = scmp.ne.s32.totalorder %s141_s7, %s1869_s10  ;;  %s1873_s29 = scalar_lea.vmem %s141_s7, 32 }
  0x90   :  { %p1874_p0 = scmp.lt.s32.totalorder %s141_s7, %s141_s7  ;;  %p1875_p1 = scmp.lt.s32.totalorder %s1873_s29, %s1869_s10 }
  0x92   :  { %p1876_p2 = por %p1875_p1, %p1874_p0 }
  0x94   :  { %121 = dma.hbm_to_vmem [thread:$0]  %s2526_s16, 256, %s116_s8, [#allocation12], %s2049_s2, %s2049_s2, %s2050_s9  }
  0x95   :  { %p1877_p3 = pnand %p1876_p2, %p1870_p13 }
  0x97   :  { %1880 = shalt.err (!%p1877_p3)
}
  0x98   :  { %s2527_s4 = sld [smem:[#allocation54_spill]]  ;;  %s2057_s3 = smov [#allocation19]  }
  0x99   :  { %s161_s12 = sshll.u32 %s2057_s3, 4  ;;  %s2058_s11 = smov [#allocation22]   ;;  %s162_s12 = int_to_ptr.vmem [resolvable:$true] %s161_s12 }
  0x9a   :  { %s184_s14 = sshll.u32 %s2058_s11, 4  ;;  %s1889_s5 = scalar_lea.vmem %s162_s12, 512  ;;  %s185_s14 = int_to_ptr.vmem [resolvable:$true] %s184_s14 }
  0x9b   :  { %p1890_p4 = scmp.ne.s32.totalorder %s162_s12, %s1889_s5  ;;  %p1894_p5 = scmp.lt.s32.totalorder %s162_s12, %s162_s12 }
  0x9c   :  { %p1895_p6 = scmp.lt.s32.totalorder %s1889_s5, %s1889_s5 }
  0x9e   :  { %143 = dma.hbm_to_vmem [thread:$0]  %s2527_s4, 16, %s141_s7, [#allocation15]  }
  0x9f   :  { %p1896_p7 = por %p1895_p6, %p1894_p5 }
  0xa1   :  { %p1897_p8 = pnand %p1896_p7, %p1890_p4 }
  0xa3   :  { %1900 = shalt.err (!%p1897_p8)
}
  0xa4   :  { %167 = dma.hbm_to_vmem [thread:$0]  %s2489_s13, 512, %s162_s12, [#allocation18], %s2049_s2, %s2049_s2, %s2050_s9  }
  0xa5   :  { %s1909_s7 = scalar_lea.vmem %s185_s14, 16  ;;  %s1913_s0 = scalar_lea.vmem %s185_s14, 32 }
  0xa6   :  { %p1910_p9 = scmp.ne.s32.totalorder %s185_s14, %s1909_s7  ;;  %p1914_p10 = scmp.lt.s32.totalorder %s185_s14, %s185_s14 }
  0xa7   :  { %p1915_p11 = scmp.lt.s32.totalorder %s1913_s0, %s1909_s7 }
  0xa9   :  { %p1916_p12 = por %p1915_p11, %p1914_p10 }
  0xab   :  { %p1917_p13 = pnand %p1916_p12, %p1910_p9 }
  0xad   :  { %1920 = shalt.err (!%p1917_p13)
}
  0xae   :  { %187 = dma.hbm_to_vmem [thread:$0]  %s2491_s15, 16, %s185_s14, [#allocation21]  }
  0xaf   :  { %s2059_s10 = smov [#allocation25]   ;;  %s2060_s1 = smov [#allocation26]  }
  0xb0   :  { %s205_s29 = sshll.u32 %s2059_s10, 4  ;;  %s218_s6 = sshll.u32 %s2060_s1, 4  ;;  %s206_s29 = int_to_ptr.vmem [resolvable:$true] %s205_s29  ;;  %s219_s6 = int_to_ptr.vmem [resolvable:$true] %s218_s6 }
  0xb1   :  { %s1929_s4 = scalar_lea.vmem %s206_s29, 512  ;;  %p1934_p1 = scmp.lt.s32.totalorder %s206_s29, %s206_s29 }
  0xb2   :  { %p1930_p0 = scmp.ne.s32.totalorder %s206_s29, %s1929_s4  ;;  %p1935_p2 = scmp.lt.s32.totalorder %s1929_s4, %s1929_s4 }
  0xb4   :  { %p1936_p3 = por %p1935_p2, %p1934_p1 }
  0xb6   :  { %p1937_p4 = pnand %p1936_p3, %p1930_p0 }
  0xb8   :  { %1940 = shalt.err (!%p1937_p4)
}
  0xb9   :  { %211 = dma.hbm_to_vmem [thread:$0]  %s2493_s17, 512, %s206_s29, [#allocation24], %s2049_s2, %s2049_s2, %s2050_s9  }
  0xba   :  { %s1949_s15 = scalar_lea.vmem %s219_s6, 16  ;;  %s1953_s12 = scalar_lea.vmem %s219_s6, 32 }
  0xbb   :  { %p1950_p5 = scmp.ne.s32.totalorder %s219_s6, %s1949_s15  ;;  %p1954_p6 = scmp.lt.s32.totalorder %s219_s6, %s219_s6 }
  0xbc   :  { %p1955_p7 = scmp.lt.s32.totalorder %s1953_s12, %s1949_s15 }
  0xbe   :  { %p1956_p8 = por %p1955_p7, %p1954_p6 }
  0xc0   :  { %p1957_p9 = pnand %p1956_p8, %p1950_p5 }
  0xc2   :  { %1960 = shalt.err (!%p1957_p9)
}
  0xc3   :  { %221 = dma.hbm_to_vmem [thread:$0]  %s2494_s18, 16, %s219_s6, [#allocation27]  }
  0xc4   :  { %2021 = dma.done.wait [#allocation3], 256  }
  0xc5   :  { %2022 = vsyncadd [#allocation3], 4294967040 }
  0xc6   :  { %2023 = dma.done.wait [#allocation6], 64  }
  0xc7   :  { %2024 = vsyncadd [#allocation6], 4294967232 }
  0xc8   :  { %2025 = dma.done.wait [#allocation9], 64  }
  0xc9   :  { %2026 = vsyncadd [#allocation9], 4294967232 }
  0xca   :  { %2027 = dma.done.wait [#allocation12], 272  }
  0xcb   :  { %2028 = vsyncadd [#allocation12], 4294967024 }
  0xcc   :  { %2029 = dma.done.wait [#allocation15], 32  }
  0xcd   :  { %2030 = vsyncadd [#allocation15], 4294967264 }
  0xce   :  { %2031 = dma.done.wait [#allocation18], 1024  }
  0xcf   :  { %2032 = vsyncadd [#allocation18], 4294966272 }
  0xd0   :  { %2033 = dma.done.wait [#allocation21], 32  }
  0xd1   :  { %2034 = vsyncadd [#allocation21], 4294967264 }
  0xd2   :  { %2035 = dma.done.wait [#allocation24], 1024  }
  0xd3   :  { %2036 = vsyncadd [#allocation24], 4294966272 }
  0xd4   :  { %2037 = dma.done.wait [#allocation27], 16  }
  0xd5   :  { %2038 = vsyncadd [#allocation27], 4294967280  ;;  %v2061_v0 = vmov 0.0   ;;  %vm2062_vm0 = vmmov 0   ;;  %v371_v1 = vld [vmem:[#allocation13 + $0x8] sm:$0xff]  ;;  %v370_v2 = vld [vmem:[#allocation13] sm:$0xff]  ;;  %v652_v46 = vlaneseq }
  0xd6   :  { %1481 = vmatprep.subr.mxu1 %v2061_v0  ;;  %1485 = vmatprep.mubr.msk.f32.mxu1 %vm2062_vm0, %v2061_v0  ;;  %v368_v3 = vld [vmem:[#allocation5] sm:$0x3]  ;;  %vm384_vm1 = vcmask 130048   ;;  %s2528_s2 = sld [smem:[#allocation52_spill]]  ;;  %vm286_vm2 = vcmask 261120   ;;  %s2063_s30 = smov 64  }
  0xd7   :  { %1482 = vmatpush3.msra.mxu1 %v371_v1  ;;  %v369_v8 = vld [vmem:[#allocation7] sm:$0x3]  ;;  %v1398_v11 = vld [vmem:[#allocation16] ss:$0 sm:$0xff]  ;;  %v1396_v15 = vld [vmem:[#allocation14] ss:$0 sm:$0xff] }
  0xd8   :  { %1483 = vmatprep.subr.mxu1 %v2061_v0  ;;  %s2529_s29 = sld [smem:[#allocation48_spill]]  ;;  %v2310_v28 = vld [vmem:[#allocation2] sm:$0xff]  ;;  %s2064_s12 = smov 96   ;;  %v2321_v32 = vld [vmem:[#allocation2 + $0x8] sm:$0xff]  ;;  %vm570_vm3 = vcmask 254976   ;;  %v653_v48 = vshrl.u32 %v652_v46, 7 }
  0xd9   :  { %1484 = vmatpush3.msra.mxu1 %v370_v2  ;;  %1478 = vmatprep.mubr.msk.f32.mxu0 %vm286_vm2, %v2310_v28  ;;  %s2530_s17 = sld [smem:[#allocation49_spill]]  ;;  %s2065_s18 = smov 32   ;;  %v2066_v44 = vmov 1966171168   ;;  %v1402_v63 = vld [vmem:[#allocation11] ss:$0 sm:$0xff] }
  0xda   :  { %1486 = vmatmul.mubr.msk.f32.vlgmr.msra.gmra.mxu1 %vm384_vm1, %v368_v3  ;;  %1488 = vmatprep.subr.mxu1 %v2061_v0  ;;  %v650_v45 = vunpack.c.l.s4 %v2066_v44  ;;  %v673_v54 = vsub.s32 0, %v653_v48  ;;  %vm752_vm4 = vcmask 1041409   ;;  %vm773_vm5 = vcmask 523264   ;;  %s2067_s1 = smov [#allocation29]   ;;  %s2068_s4 = smov [#allocation28]  }
  0xdb   :  { %1496 = vmatprep.mubr.msk.f32.mxu1 %vm2062_vm0, %v2061_v0  ;;  %s1358_s6 = sshll.u32 %s2067_s1, 4  ;;  %s1359_s6 = int_to_ptr.vmem [resolvable:$true] %s1358_s6 }
  0xdc   :  { %v375_v4 = vld [vmem:[%s2528_s2 + $0x18] sm:$0xff]  ;;  %v374_v5 = vld [vmem:[%s2528_s2 + $0x10] sm:$0xff]  ;;  %v373_v6 = vld [vmem:[%s2528_s2 + $0x8] sm:$0xff]  ;;  %v651_v47 = vunpack.c.0.s8 %v650_v45  ;;  %s1961_s13 = scalar_lea.vmem %s1359_s6, 32  ;;  %p1966_p11 = scmp.lt.s32.totalorder %s1359_s6, %s1359_s6 }
  0xdd   :  { %1489 = vmatpush3.msra.mxu1 %v375_v4  ;;  %v372_v7 = vld [vmem:[%s2528_s2] sm:$0xff]  ;;  %p1962_p10 = scmp.ne.s32.totalorder %s1359_s6, %s1961_s13  ;;  %p1967_p12 = scmp.lt.s32.totalorder %s1961_s13, %s1961_s13 }
  0xde   :  { %1490 = vmatprep.subr.mxu1 %v2061_v0  ;;  %v285_v26 = vld [vmem:[%s2529_s29 + $0x18] sm:$0xff]  ;;  %v284_v27 = vld [vmem:[%s2529_s29 + $0x10] sm:$0xff]  ;;  %v283_v29 = vld [vmem:[%s2529_s29 + $0x8] sm:$0xff]  ;;  %v654_v50 = vsub.s32 %v651_v47, %v653_v48 }
  0xdf   :  { %1491 = vmatpush3.msra.mxu1 %v374_v5  ;;  %1470 = vmatprep.subr.mxu0 %v285_v26  ;;  %v282_v31 = vld [vmem:[%s2529_s29] sm:$0xff]  ;;  %v575_v33 = vld [vmem:[%s2530_s17 + $0x18] sm:$0xff]  ;;  %v574_v34 = vld [vmem:[%s2530_s17 + $0x10] sm:$0xff]  ;;  %p1968_p13 = por %p1967_p12, %p1966_p11 }
  0xe0   :  { %1492 = vmatprep.subr.mxu1 %v2061_v0  ;;  %1471 = vmatpush3.msra.mxu0 %v285_v26  ;;  %v573_v35 = vld [vmem:[%s2530_s17 + $0x8] sm:$0xff]  ;;  %v572_v36 = vld [vmem:[%s2530_s17] sm:$0xff] }
  0xe1   :  { %1493 = vmatpush3.msra.mxu1 %v373_v6  ;;  %1472 = vmatprep.subr.mxu0 %v284_v27  ;;  %p1969_p0 = pnand %p1968_p13, %p1962_p10 }
  0xe2   :  { %1494 = vmatprep.subr.mxu1 %v2061_v0  ;;  %1473 = vmatpush3.msra.mxu0 %v284_v27 }
  0xe3   :  { %1495 = vmatpush3.msra.mxu1 %v372_v7  ;;  %1474 = vmatprep.subr.mxu0 %v283_v29  ;;  %v765_v7 = vld [vmem:[%s2496_s20 + $0x38] sm:$0xff] }
  0xe4   :  { %1497 = vmatmul.mubr.msk.f32.vlgmr.msra.gmra.mxu1 %vm286_vm2, %v369_v8  ;;  %1510 = vmatprep.subr.mxu1 %v2061_v0 }
  0xe5   :  { %1526 = vmatprep.mubr.msk.f32.mxu1 %vm2062_vm0, %v2061_v0  ;;  %1475 = vmatpush3.msra.mxu0 %v283_v29 }
  0xe6   :  { %1476 = vmatprep.subr.mxu0 %v282_v31  ;;  %1511 = vmatpush3.msra.mxu1 %v765_v7 }
  0xe7   :  { %1477 = vmatpush3.msra.mxu0 %v282_v31  ;;  %1512 = vmatprep.subr.mxu1 %v2061_v0 }
  0xe8   :  { %1479 = vmatmul.mubr.msk.f32.vlgmr.msra.gmra.mxu0 %vm286_vm2, %v2321_v32  ;;  %1499 = vmatprep.subr.mxu0 %v2061_v0 }
  0xe9   :  { %1507 = vmatprep.mubr.msk.f32.mxu0 %vm2062_vm0, %v2061_v0  ;;  %1500 = vmatpush3.msra.mxu0 %v575_v33 }
  0xea   :  { %1501 = vmatprep.subr.mxu0 %v2061_v0 }
  0xeb   :  { %1502 = vmatpush3.msra.mxu0 %v574_v34 }
  0xec   :  { %1503 = vmatprep.subr.mxu0 %v2061_v0 }
  0xed   :  { %1504 = vmatpush3.msra.mxu0 %v573_v35 }
  0xee   :  { %1505 = vmatprep.subr.mxu0 %v2061_v0 }
  0xef   :  { %1506 = vmatpush3.msra.mxu0 %v572_v36 }
  0xf0   :  { %1529 = vmatprep.subr.mxu0 %v2061_v0 }
 0x19a   :  { %v454_v9 = vpop.f32.mrf.mxu1 }
 0x19b   :  { %v455_v16 = vadd.f32 %v1396_v15, %v454_v9  ;;  %v763_v9 = vld [vmem:[%s2496_s20 + $0x28] sm:$0xff] }
 0x19c   :  { %v1487_v10 = vpop.f32.mrf.mxu1 }
 0x19d   :  { %v762_v10 = vld [vmem:[%s2496_s20 + $0x20] sm:$0xff] }
 0x1a4   :  { %v533_v12 = vpop.f32.mrf.mxu1 }
 0x1a5   :  { %v534_v13 = vadd.f32 %v1398_v11, %v533_v12  ;;  %v761_v11 = vld [vmem:[%s2496_s20 + $0x18] sm:$0xff]  ;;  %v760_v12 = vld [vmem:[%s2496_s20 + $0x10] sm:$0xff] }
 0x1a6   :  { %v1498_v14 = vpop.f32.mrf.mxu1 }
 0x1a7   :  { %545 = vrot.lane.b32.xlu0 %v534_v13, %s2063_s30  ;;  %v537_v17 = vadd.f32 %v534_v13, %v455_v16  ;;  %v759_v13 = vld [vmem:[%s2496_s20 + $0x8] sm:$0xff] }
 0x1a8   :  { %v1480_v49 = vpop.f32.mrf.mxu0 }
 0x1a9   :  { %v1400_v18 = vmul.f32 -1.442695, %v537_v17 }
 0x1aa   :  { %v359_v51 = vpop.f32.mrf.mxu0 }
 0x1ab   :  { %1611 = vpow2.f32 %v1400_v18 }
 0x1b8   :  { %v1612_v19 = vpop.eup %1611 }
 0x1b9   :  { %v541_v20 = vadd.f32 1.0, %v1612_v19 }
 0x1bb   :  { %1613 = vrcp.f32 %v541_v20 }
 0x1c8   :  { %v1614_v21 = vpop.eup %1613 }
 0x1c9   :  { %v555_v38 = vsub.f32 1.0, %v1614_v21 }
 0x219   :  { %v546_v22 = vpop.permute.xlu0 %545 }
 0x21a   :  { %v548_v23 = vmul.f32 %v1614_v21, %v546_v22 }
 0x21c   :  { %550 = vrot.lane.b32.xlu0 %v548_v23, %s2063_s30 }
 0x28e   :  { %v551_v24 = vpop.permute.xlu0 %550 }
 0x28f   :  { %v553_v25 = vadd.f32 %v551_v24, %v455_v16 }
 0x291   :  { %1615 = vtanh.f32 %v553_v25 }
 0x29e   :  { %v1616_v30 = vpop.eup %1615 }
 0x29f   :  { %557 = vrot.lane.b32.xlu1 %v1616_v30, %s2064_s12 }
 0x2a3   :  { %561 = vrot.lane.b32.xlu1 %v369_v8, %s2065_s18  ;;  %v764_v8 = vld [vmem:[%s2496_s20 + $0x30] sm:$0xff] }
 0x2a4   :  { %1513 = vmatpush3.msra.mxu1 %v764_v8 }
 0x2a5   :  { %1514 = vmatprep.subr.mxu1 %v2061_v0 }
 0x2a6   :  { %1515 = vmatpush3.msra.mxu1 %v763_v9 }
 0x2a7   :  { %1516 = vmatprep.subr.mxu1 %v2061_v0 }
 0x2a8   :  { %1517 = vmatpush3.msra.mxu1 %v762_v10 }
 0x2a9   :  { %1518 = vmatprep.subr.mxu1 %v2061_v0 }
 0x2aa   :  { %1519 = vmatpush3.msra.mxu1 %v761_v11  ;;  %v848_v11 = vld [vmem:[#allocation17] sm:$0xff] }
 0x2ab   :  { %1520 = vmatprep.subr.mxu1 %v2061_v0 }
 0x2ac   :  { %1521 = vmatpush3.msra.mxu1 %v760_v12  ;;  %v1403_v12 = vld [vmem:[%s2497_s21] ss:$0 sm:$0xff] }
 0x2ad   :  { %1522 = vmatprep.subr.mxu1 %v2061_v0 }
 0x2ae   :  { %1523 = vmatpush3.msra.mxu1 %v759_v13 }
 0x2af   :  { %1524 = vmatprep.subr.mxu1 %v2061_v0 }
 0x311   :  { %v558_v37 = vpop.permute.xlu1 %557 }
 0x312   :  { %v560_v40 = vmul.f32 %v558_v37, %v555_v38 }
 0x315   :  { %v562_v39 = vpop.permute.xlu1 %561 }
 0x316   :  { %v564_v41 = vmul.f32 %v1614_v21, %v562_v39 }
 0x318   :  { %v565_v42 = vadd.f32 %v564_v41, %v560_v40 }
 0x31a   :  { %567 = vrot.lane.b32.xlu0 %v565_v42, %s2064_s12 }
 0x38c   :  { %v2346_v43 = vpop.permute.xlu0 %567 }
 0x38d   :  { %1508 = vmatmul.mubr.msk.f32.vlgmr.msra.gmra.mxu0 %vm286_vm2, %v2346_v43  ;;  %571 = vst.msk [vmem:[#allocation28] sm:$0x3] %vm570_vm3, %v2346_v43 }
 0x38e   :  { %1537 = vmatprep.mubr.msk.f32.mxu0 %vm2062_vm0, %v2061_v0 }
 0x44d   :  { %v644_v52 = vpop.f32.mrf.mxu0 }
 0x44e   :  { %v655_v53 = vrot.slane %v644_v52, %v654_v50 }
 0x44f   :  { %v1509_v55 = vpop.f32.mrf.mxu0 }
 0x450   :  { %v656_v56 = vcombine.high %v655_v53, %v655_v53  ;;  %v663_v57 = vrot.slane %v655_v53, %v654_v50 }
 0x452   :  { %v670_v58 = vrot.slane %v656_v56, %v654_v50  ;;  %v674_v59 = vrot.slane %v663_v57, %v673_v54 }
 0x454   :  { %v678_v60 = vrot.slane %v670_v58, %v673_v54  ;;  %v681_v61 = vadd.f32 %v674_v59, %v359_v51  ;;  %v758_v58 = vld [vmem:[%s2496_s20] sm:$0xff] }
 0x455   :  { %1525 = vmatpush3.msra.mxu1 %v758_v58 }
 0x456   :  { %v682_v62 = vadd.f32 %v1480_v49, %v678_v60  ;;  %1617 = vtanh.f32 %v681_v61  ;;  %v851_v61 = vld [vmem:[#allocation17 + $0x18] sm:$0xff]  ;;  %1551 = vmatprep.subr.mxu1 %v2061_v0 }
 0x457   :  { %1530 = vmatpush3.msra.mxu0 %v851_v61 }
 0x458   :  { %1619 = vtanh.f32 %v682_v62  ;;  %v850_v62 = vld [vmem:[#allocation17 + $0x10] sm:$0xff]  ;;  %1531 = vmatprep.subr.mxu0 %v2061_v0 }
 0x459   :  { %1532 = vmatpush3.msra.mxu0 %v850_v62  ;;  %v1410_v62 = vld [vmem:[#allocation26] ss:$0 sm:$0xff] }
 0x45a   :  { %1533 = vmatprep.subr.mxu0 %v2061_v0 }
 0x463   :  { %v1618_v1 = vpop.eup %1617 }
 0x464   :  { %v692_v2 = vmul.f32 %v1618_v1, %v1402_v63 }
 0x465   :  { %v1620_v3 = vpop.eup %1619 }
 0x466   :  { %v694_v4 = vsel %vm286_vm2, %v692_v2, 0.0  ;;  %v693_v5 = vmul.f32 %v1620_v3, %v1402_v63 }
 0x467   :  { %695 = vadd.xlane.f32.xlu1 %v694_v4 }
 0x468   :  { %v697_v6 = vsel %vm286_vm2, %v693_v5, 0.0 }
 0x469   :  { %698 = vadd.xlane.f32.xlu0 %v697_v6 }
 0x4f0   :  { %v696_v14 = vpop.xlane.xlu1 %695 }
 0x4f1   :  { %v700_v15 = vrot.slane %v696_v14, 4 }
 0x4f2   :  { %v699_v16 = vpop.xlane.xlu0 %698 }
 0x4f3   :  { %v701_v17 = vmax.f32 %v696_v14, %v700_v15  ;;  %v706_v18 = vrot.slane %v699_v16, 4  ;;  %v855_v15 = vld [vmem:[#allocation19 + $0x18] sm:$0xff] }
 0x4f5   :  { %v702_v19 = vrot.slane %v701_v17, 2  ;;  %v707_v20 = vmax.f32 %v699_v16, %v706_v18  ;;  %v852_v18 = vld [vmem:[#allocation19] sm:$0xff] }
 0x4f7   :  { %v703_v21 = vmax.f32 %v701_v17, %v702_v19  ;;  %v708_v22 = vrot.slane %v707_v20, 2  ;;  %v853_v17 = vld [vmem:[#allocation19 + $0x8] sm:$0xff]  ;;  %v847_v19 = vld [vmem:[#allocation8] sm:$0x3] }
 0x4f9   :  { %v704_v23 = vrot.slane %v703_v21, 1  ;;  %v709_v24 = vmax.f32 %v707_v20, %v708_v22  ;;  %v1407_v22 = vld [vmem:[#allocation22] ss:$0 sm:$0xff] }
 0x4fb   :  { %v705_v25 = vmax.f32 %v703_v21, %v704_v23  ;;  %v710_v26 = vrot.slane %v709_v24, 1 }
 0x4fd   :  { %v712_v27 = vsub.f32 %v696_v14, %v705_v25  ;;  %v711_v29 = vmax.f32 %v709_v24, %v710_v26  ;;  %v1405_v26 = vld [vmem:[#allocation20] ss:$0 sm:$0xff] }
 0x4ff   :  { %v714_v30 = vmul.f32 1.442695, %v712_v27  ;;  %v713_v31 = vsub.f32 %v699_v16, %v711_v29 }
 0x501   :  { %1621 = vpow2.f32 %v714_v30  ;;  %v716_v33 = vmul.f32 1.442695, %v713_v31 }
 0x503   :  { %1623 = vpow2.f32 %v716_v33 }
 0x50e   :  { %v1622_v34 = vpop.eup %1621 }
 0x50f   :  { %v718_v35 = vrot.slane %v1622_v34, 4 }
 0x510   :  { %v1624_v36 = vpop.eup %1623 }
 0x511   :  { %v719_v37 = vadd.f32 %v1622_v34, %v718_v35  ;;  %v724_v38 = vrot.slane %v1624_v36, 4 }
 0x513   :  { %v720_v39 = vrot.slane %v719_v37, 2  ;;  %v725_v40 = vadd.f32 %v1624_v36, %v724_v38 }
 0x515   :  { %v721_v41 = vadd.f32 %v720_v39, %v719_v37  ;;  %v726_v42 = vrot.slane %v725_v40, 2  ;;  %v1059_v39 = vld [vmem:[#allocation25 + $0x18] sm:$0xff] }
 0x517   :  { %v722_v44 = vrot.slane %v721_v41, 1  ;;  %v727_v45 = vadd.f32 %v726_v42, %v725_v40  ;;  %v1058_v40 = vld [vmem:[#allocation25 + $0x10] sm:$0xff]  ;;  %v1057_v42 = vld [vmem:[#allocation25 + $0x8] sm:$0xff] }
 0x519   :  { %v723_v46 = vadd.f32 %v722_v44, %v721_v41  ;;  %v728_v47 = vrot.slane %v727_v45, 1  ;;  %v1055_v41 = vld [vmem:[#allocation23 + $0x18] sm:$0xff]  ;;  %v1054_v44 = vld [vmem:[#allocation23 + $0x10] sm:$0xff] }
 0x51b   :  { %v729_v48 = vadd.f32 %v728_v47, %v727_v45  ;;  %1625 = vrcp.f32 %v723_v46  ;;  %v1053_v45 = vld [vmem:[#allocation23 + $0x8] sm:$0xff]  ;;  %v1056_v46 = vld [vmem:[#allocation25] sm:$0xff] }
 0x51c   :  { %v1051_v47 = vld [vmem:[#allocation10] sm:$0x3] }
 0x51d   :  { %1627 = vrcp.f32 %v729_v48 }
 0x528   :  { %v1626_v49 = vpop.eup %1625 }
 0x529   :  { %v731_v50 = vmul.f32 %v1626_v49, %v1622_v34  ;;  %v1052_v49 = vld [vmem:[#allocation23] sm:$0xff] }
 0x52a   :  { %v1628_v51 = vpop.eup %1627 }
 0x52b   :  { %v733_v52 = vmul.f32 %v1628_v51, %v1624_v36  ;;  %v734_v53 = vmul.f32 %v731_v50, %v2310_v28 }
 0x52d   :  { %v735_v54 = vmul.f32 %v733_v52, %v2321_v32  ;;  %v736_v55 = vsel %vm286_vm2, %v734_v53, 0.0  ;;  %v849_v32 = vld [vmem:[#allocation17 + $0x8] sm:$0xff] }
 0x52e   :  { %v737_v56 = vrot.slane %v736_v55, 4  ;;  %1534 = vmatpush3.msra.mxu0 %v849_v32 }
 0x52f   :  { %v743_v57 = vsel %vm286_vm2, %v735_v54, 0.0  ;;  %1535 = vmatprep.subr.mxu0 %v2061_v0 }
 0x530   :  { %v738_v59 = vadd.f32 %v737_v56, %v736_v55  ;;  %v744_v60 = vrot.slane %v743_v57, 4  ;;  %1536 = vmatpush3.msra.mxu0 %v848_v11  ;;  %v1412_v56 = vld [vmem:[%s2495_s19] ss:$0 sm:$0xff]  ;;  %v1257_v11 = vld [vmem:[%s2498_s22 + $0x10] sm:$0xff] }
 0x531   :  { %1540 = vmatprep.subr.mxu0 %v2061_v0 }
 0x532   :  { %v739_v63 = vrot.slane %v738_v59, 2  ;;  %v745_v28 = vadd.f32 %v744_v60, %v743_v57 }
 0x534   :  { %v740_v1 = vadd.f32 %v739_v63, %v738_v59  ;;  %v746_v2 = vrot.slane %v745_v28, 2 }
 0x536   :  { %v741_v3 = vrot.slane %v740_v1, 1  ;;  %v747_v4 = vadd.f32 %v746_v2, %v745_v28 }
 0x538   :  { %v748_v5 = vrot.slane %v747_v4, 1  ;;  %v742_v6 = vadd.f32 %v741_v3, %v740_v1 }
 0x53a   :  { %v749_v7 = vadd.f32 %v748_v5, %v747_v4 }
 0x53c   :  { %v753_v8 = vsel %vm752_vm4, %v749_v7, %v742_v6 }
 0x53d   :  { %754 = vrot.lane.b32.xlu0 %v753_v8, %s2065_s18 }
 0x5af   :  { %v755_v9 = vpop.permute.xlu0 %754 }
 0x5b0   :  { %v757_v10 = vsel %vm286_vm2, %v2346_v43, %v755_v9  ;;  %v854_v43 = vld [vmem:[#allocation19 + $0x10] sm:$0xff] }
 0x5b1   :  { %1527 = vmatmul.mubr.msk.f32.vlgmr.msra.gmra.mxu1 %vm773_vm5, %v757_v10  ;;  %v1258_v10 = vld [vmem:[%s2498_s22 + $0x18] sm:$0xff] }
 0x5b2   :  { %1559 = vmatprep.mubr.msk.f32.mxu1 %vm2062_vm0, %v2061_v0  ;;  %1552 = vmatpush3.msra.mxu1 %v1055_v41 }
 0x5b3   :  { %1553 = vmatprep.subr.mxu1 %v2061_v0 }
 0x5b4   :  { %1554 = vmatpush3.msra.mxu1 %v1054_v44 }
 0x5b5   :  { %1555 = vmatprep.subr.mxu1 %v2061_v0 }
 0x5b6   :  { %1556 = vmatpush3.msra.mxu1 %v1053_v45 }
 0x5b7   :  { %1557 = vmatprep.subr.mxu1 %v2061_v0 }
 0x5b8   :  { %1558 = vmatpush3.msra.mxu1 %v1052_v49 }
 0x5b9   :  { %1573 = vmatprep.subr.mxu1 %v2061_v0 }
 0x671   :  { %v843_v13 = vpop.f32.mrf.mxu1 }
 0x672   :  { %v2404_v14 = vadd.f32 %v1403_v12, %v843_v13  ;;  %v1256_v12 = vld [vmem:[%s2498_s22 + $0x8] sm:$0xff] }
 0x673   :  { %v1528_v16 = vpop.f32.mrf.mxu1 }
 0x674   :  { %1538 = vmatmul.mubr.msk.f32.vlgmr.msra.gmra.mxu0 %vm286_vm2, %v2404_v14 }
 0x675   :  { %1541 = vmatpush3.msra.mxu0 %v855_v15  ;;  %1548 = vmatprep.mubr.msk.f32.mxu0 %vm2062_vm0, %v2061_v0 }
 0x676   :  { %1542 = vmatprep.subr.mxu0 %v2061_v0 }
 0x677   :  { %1543 = vmatpush3.msra.mxu0 %v854_v43 }
 0x678   :  { %1544 = vmatprep.subr.mxu0 %v2061_v0 }
 0x679   :  { %1545 = vmatpush3.msra.mxu0 %v853_v17 }
 0x67a   :  { %1546 = vmatprep.subr.mxu0 %v2061_v0 }
 0x67b   :  { %1547 = vmatpush3.msra.mxu0 %v852_v18 }
 0x67c   :  { %1549 = vmatmul.mubr.msk.f32.vlgmr.msra.gmra.mxu0 %vm286_vm2, %v847_v19  ;;  %1562 = vmatprep.subr.mxu0 %v2061_v0 }
 0x67d   :  { %1570 = vmatprep.mubr.msk.f32.mxu0 %vm2062_vm0, %v2061_v0  ;;  %1563 = vmatpush3.msra.mxu0 %v1059_v39 }
 0x67e   :  { %1564 = vmatprep.subr.mxu0 %v2061_v0 }
 0x67f   :  { %1565 = vmatpush3.msra.mxu0 %v1058_v40 }
 0x680   :  { %1566 = vmatprep.subr.mxu0 %v2061_v0 }
 0x681   :  { %1567 = vmatpush3.msra.mxu0 %v1057_v42 }
 0x682   :  { %1568 = vmatprep.subr.mxu0 %v2061_v0 }
 0x683   :  { %1569 = vmatpush3.msra.mxu0 %v1056_v46 }
 0x684   :  { %1571 = vmatmul.mubr.msk.f32.vlgmr.msra.gmra.mxu0 %vm286_vm2, %v1051_v47 }
 0x734   :  { %v933_v20 = vpop.f32.mrf.mxu0 }
 0x735   :  { %v934_v27 = vadd.f32 %v1405_v26, %v933_v20 }
 0x736   :  { %v1539_v21 = vpop.f32.mrf.mxu0 }
 0x73c   :  { %v1012_v23 = vpop.f32.mrf.mxu0 }
 0x73d   :  { %v1013_v24 = vadd.f32 %v1407_v22, %v1012_v23 }
 0x73e   :  { %v1550_v25 = vpop.f32.mrf.mxu0 }
 0x73f   :  { %1024 = vrot.lane.b32.xlu1 %v1013_v24, %s2063_s30  ;;  %v1016_v29 = vadd.f32 %v1013_v24, %v934_v27 }
 0x741   :  { %v1409_v30 = vmul.f32 -1.442695, %v1016_v29 }
 0x743   :  { %1629 = vpow2.f32 %v1409_v30 }
 0x744   :  { %v1216_v57 = vpop.f32.mrf.mxu0 }
 0x745   :  { %v1217_v58 = vadd.f32 %v1412_v56, %v1216_v57 }
 0x746   :  { %v1572_v59 = vpop.f32.mrf.mxu0 }
 0x750   :  { %v1630_v31 = vpop.eup %1629 }
 0x751   :  { %v1020_v33 = vadd.f32 1.0, %v1630_v31 }
 0x753   :  { %1631 = vrcp.f32 %v1020_v33 }
 0x760   :  { %v1632_v34 = vpop.eup %1631 }
 0x761   :  { %v1034_v51 = vsub.f32 1.0, %v1632_v34 }
 0x7b1   :  { %v1025_v35 = vpop.permute.xlu1 %1024 }
 0x7b2   :  { %v1027_v36 = vmul.f32 %v1632_v34, %v1025_v35 }
 0x7b4   :  { %1029 = vrot.lane.b32.xlu1 %v1027_v36, %s2063_s30 }
 0x7b8   :  { %1040 = vrot.lane.b32.xlu1 %v847_v19, %s2065_s18 }
 0x7bc   :  { %1228 = vrot.lane.b32.xlu1 %v1217_v58, %s2063_s30 }
 0x826   :  { %v1030_v37 = vpop.permute.xlu1 %1029 }
 0x827   :  { %v1032_v38 = vadd.f32 %v1030_v37, %v934_v27 }
 0x829   :  { %1633 = vtanh.f32 %v1032_v38 }
 0x82a   :  { %v1041_v50 = vpop.permute.xlu1 %1040 }
 0x82b   :  { %v1043_v53 = vmul.f32 %v1632_v34, %v1041_v50 }
 0x82e   :  { %v1229_v5 = vpop.permute.xlu1 %1228 }
 0x836   :  { %v1634_v48 = vpop.eup %1633 }
 0x837   :  { %1036 = vrot.lane.b32.xlu0 %v1634_v48, %s2064_s12 }
 0x8a9   :  { %v1037_v52 = vpop.permute.xlu0 %1036 }
 0x8aa   :  { %v1039_v54 = vmul.f32 %v1037_v52, %v1034_v51 }
 0x8ac   :  { %v1044_v55 = vadd.f32 %v1043_v53, %v1039_v54 }
 0x8ae   :  { %1046 = vrot.lane.b32.xlu0 %v1044_v55, %s2064_s12 }
 0x920   :  { %v1047_v60 = vpop.permute.xlu0 %1046 }
 0x921   :  { %v1050_v61 = vadd.f32 %v1047_v60, %v2404_v14  ;;  %1049 = vst.msk [vmem:[#allocation29] sm:$0x3] %vm570_vm3, %v1047_v60  ;;  %v1255_v14 = vld [vmem:[%s2498_s22] sm:$0xff]  ;;  %s1348_s22 = sshll.u32 %s2068_s4, 4  ;;  %s1349_s22 = int_to_ptr.vmem [resolvable:$true] %s1348_s22 }
 0x923   :  { %1560 = vmatmul.mubr.msk.f32.vlgmr.msra.gmra.mxu1 %vm286_vm2, %v1050_v61 }
 0x924   :  { %1581 = vmatprep.mubr.msk.f32.mxu1 %vm2062_vm0, %v2061_v0  ;;  %1574 = vmatpush3.msra.mxu1 %v1258_v10 }
 0x925   :  { %1575 = vmatprep.subr.mxu1 %v2061_v0 }
 0x926   :  { %1576 = vmatpush3.msra.mxu1 %v1257_v11 }
 0x927   :  { %1577 = vmatprep.subr.mxu1 %v2061_v0 }
 0x928   :  { %1578 = vmatpush3.msra.mxu1 %v1256_v12 }
 0x929   :  { %1579 = vmatprep.subr.mxu1 %v2061_v0 }
 0x92a   :  { %1580 = vmatpush3.msra.mxu1 %v1255_v14 }
 0x9e3   :  { %v1137_v63 = vpop.f32.mrf.mxu1 }
 0x9e4   :  { %v1138_v28 = vadd.f32 %v1410_v62, %v1137_v63 }
 0x9e5   :  { %v1561_v32 = vpop.f32.mrf.mxu1 }
 0x9e6   :  { %v1220_v1 = vadd.f32 %v1217_v58, %v1138_v28 }
 0x9e8   :  { %v1414_v2 = vmul.f32 -1.442695, %v1220_v1 }
 0x9ea   :  { %1635 = vpow2.f32 %v1414_v2 }
 0x9f7   :  { %v1636_v3 = vpop.eup %1635 }
 0x9f8   :  { %v1224_v4 = vadd.f32 1.0, %v1636_v3 }
 0x9fa   :  { %1637 = vrcp.f32 %v1224_v4 }
 0xa07   :  { %v1638_v6 = vpop.eup %1637 }
 0xa08   :  { %v1231_v7 = vmul.f32 %v1638_v6, %v1229_v5  ;;  %v1238_v16 = vsub.f32 1.0, %v1638_v6 }
 0xa0a   :  { %1233 = vrot.lane.b32.xlu0 %v1231_v7, %s2063_s30 }
 0xa0e   :  { %1244 = vrot.lane.b32.xlu0 %v1051_v47, %s2065_s18 }
 0xa7c   :  { %v1234_v8 = vpop.permute.xlu0 %1233 }
 0xa7d   :  { %v1236_v9 = vadd.f32 %v1234_v8, %v1138_v28 }
 0xa7f   :  { %1639 = vtanh.f32 %v1236_v9 }
 0xa80   :  { %v1245_v15 = vpop.permute.xlu0 %1244 }
 0xa81   :  { %v1247_v17 = vmul.f32 %v1638_v6, %v1245_v15 }
 0xa8c   :  { %v1640_v13 = vpop.eup %1639 }
 0xa8d   :  { %1240 = vrot.lane.b32.xlu1 %v1640_v13, %s2064_s12 }
 0xaff   :  { %v1241_v43 = vpop.permute.xlu1 %1240 }
 0xb00   :  { %v1243_v18 = vmul.f32 %v1241_v43, %v1238_v16 }
 0xb02   :  { %v1248_v19 = vadd.f32 %v1247_v17, %v1243_v18 }
 0xb04   :  { %1250 = vrot.lane.b32.xlu1 %v1248_v19, %s2064_s12 }
 0xb76   :  { %v1251_v20 = vpop.permute.xlu1 %1250 }
 0xb77   :  { %1253 = vst.msk [vmem:[#allocation31] sm:$0x3] %vm570_vm3, %v1251_v20  ;;  %v1254_v0 = vadd.f32 %v1251_v20, %v1050_v61 }
 0xb79   :  { %1582 = vmatmul.mubr.msk.f32.vlgmr.msra.gmra.mxu1 %vm286_vm2, %v1254_v0 }
 0xb7a   :  { %1972 = shalt.err (!%p1969_p0)
}
 0xb7b   :  { %1361 = dma.vmem_to_hbm [thread:$0]  %s1359_s6, 32, %s2502_s26, [#allocation30]  }
 0xb7c   :  { %s1981_s15 = scalar_lea.vmem %s1349_s22, 32  ;;  %p1986_p2 = scmp.lt.s32.totalorder %s1349_s22, %s1349_s22 }
 0xb7d   :  { %p1982_p1 = scmp.ne.s32.totalorder %s1349_s22, %s1981_s15  ;;  %p1987_p3 = scmp.lt.s32.totalorder %s1981_s15, %s1981_s15 }
 0xb7f   :  { %p1988_p4 = por %p1987_p3, %p1986_p2 }
 0xb81   :  { %p1989_p5 = pnand %p1988_p4, %p1982_p1 }
 0xb83   :  { %1992 = shalt.err (!%p1989_p5)
}
 0xb84   :  { %1351 = dma.vmem_to_hbm [thread:$0]  %s1349_s22, 32, %s2501_s25, [#allocation4]  }
 0xb85   :  { %s2069_s17 = smov [#allocation31]  }
 0xb86   :  { %s1368_s2 = sshll.u32 %s2069_s17, 4  ;;  %s1369_s2 = int_to_ptr.vmem [resolvable:$true] %s1368_s2 }
 0xb87   :  { %s2001_s9 = scalar_lea.vmem %s1369_s2, 32  ;;  %p2006_p7 = scmp.lt.s32.totalorder %s1369_s2, %s1369_s2 }
 0xb88   :  { %p2002_p6 = scmp.ne.s32.totalorder %s1369_s2, %s2001_s9  ;;  %p2007_p8 = scmp.lt.s32.totalorder %s2001_s9, %s2001_s9 }
 0xb8a   :  { %p2008_p9 = por %p2007_p8, %p2006_p7 }
 0xb8c   :  { %p2009_p10 = pnand %p2008_p9, %p2002_p6 }
 0xb8e   :  { %2012 = shalt.err (!%p2009_p10)
}
 0xb8f   :  { %1371 = dma.vmem_to_hbm [thread:$0]  %s1369_s2, 32, %s2503_s27, [#allocation30]   ;;  %v1415_v21 = vld [vmem:[%s2499_s23] ss:$0 sm:$0xff] }
 0xc39   :  { %v1335_v22 = vpop.f32.mrf.mxu1 }
 0xc3a   :  { %v1336_v23 = vadd.f32 %v1415_v21, %v1335_v22 }
 0xc3b   :  { %v1583_v24 = vpop.f32.mrf.mxu1 }
 0xc3c   :  { %1339 = vst.msk [vmem:[%s2500_s24] sm:$0x3] %vm570_vm3, %v1336_v23 }
 0xc3d   :  { %2039 = dma.done.wait [#allocation4], 32  }
 0xc3e   :  { %2040 = vsyncadd [#allocation4], 4294967264 }
 0xc3f   :  { %2041 = dma.done.wait [#allocation30], 64  }
 0xc40   :  { %2042 = vsyncadd [#allocation30], 4294967232 }
 0xc41   :  { %1383 = vsyncpa [#allocation3], 1 }
 0xc42   :  { %1384 = vsyncpa [#allocation6], 1 }
 0xc43   :  { %1385 = vsyncpa [#allocation9], 1 }
 0xc44   :  { %1386 = vsyncpa [#allocation12], 1 }
 0xc45   :  { %1387 = vsyncpa [#allocation15], 1 }
 0xc46   :  { %1388 = vsyncpa [#allocation18], 1 }
 0xc47   :  { %1389 = vsyncpa [#allocation21], 1 }
 0xc48   :  { %1390 = vsyncpa [#allocation24], 1 }
 0xc49   :  { %1391 = vsyncpa [#allocation27], 1 }
 0xc4a   :  { %1392 = vsyncpa [#allocation4], 1 }
 0xc4b   :  { %1393 = vsyncpa [#allocation30], 1 }

</bundles_post_ra>
